<compile_context>
chip_gen: v5e
topology: v5e:2x2
jax: 0.10.0
libtpu: 0.0.40
codegen_flags: <defaults>
</compile_context>

<pallas_src>
import jax
import jax.numpy as jnp
from jax import lax
from jax.experimental import pallas as pl
from jax.experimental.pallas import tpu as pltpu

LANE = 128  # TPU lane width


def _cdiv(a, b):
    return (a + b - 1) // b


def mlp_kernel(x_ref, w1_ref, b1_ref, w2_ref, b2_ref, w3_ref, b3_ref,
               w4_ref, b4_ref, o_ref):
    # x_ref: (tile_b, F) f32 tile in its natural HBM layout.
    # Layer 1 contracts the feature axis of both operands -> (64, tile_b),
    # putting the batch on the lane axis for the whole network so every
    # matmul has a >=128-wide N and the final store is lane-dense.
    h = lax.dot_general(
        w1_ref[...], x_ref[...],
        dimension_numbers=(((1,), (1,)), ((), ())),
        preferred_element_type=jnp.float32) + b1_ref[...]           # (64, TB) f32
    h = jnp.maximum(h, 0.0)

    h = jnp.dot(w2_ref[...], h.astype(jnp.bfloat16),
                preferred_element_type=jnp.float32) + b2_ref[...]   # (64, TB)
    h = jnp.maximum(h, 0.0)

    h = jnp.dot(w3_ref[...], h.astype(jnp.bfloat16),
                preferred_element_type=jnp.float32) + b3_ref[...]   # (32, TB)
    h = jnp.maximum(h, 0.0)

    h = jnp.dot(w4_ref[...], h.astype(jnp.bfloat16),
                preferred_element_type=jnp.float32) + b4_ref[...]   # (8, TB); row 0 real
    # Store only the real logit row: lane-dense (1, tile_b) unmasked stores.
    o_ref[...] = jax.nn.sigmoid(h[0:1, :]).astype(o_ref.dtype)


def _pick_tiling(batch, max_tile=4096):
    """Fewest grid steps; even (>=2) when possible so v7x's 2 TCs both work."""
    n_chunks = _cdiv(batch, LANE)          # number of 128-wide batch chunks
    if n_chunks <= 1:
        return LANE, 1
    steps = 2
    while _cdiv(n_chunks, steps) * LANE > max_tile:
        steps += 2
    tile_b = _cdiv(n_chunks, steps) * LANE
    return tile_b, steps


def linear_model_forward(x, params):
    """Forward pass of LinearModel. x: (B, F) float32. Returns (B, 1) float32."""
    (w1, b1), (w2, b2), (w3, b3), (w4, b4) = params
    B, F = x.shape
    OUT_PAD = 8   # fc4's 1-wide head padded to a sublane group inside the kernel

    tile_b, steps = _pick_tiling(B)
    B_pad = tile_b * steps
    if B_pad != B:   # only copies when B is not already tile-aligned
        x = jnp.pad(x, ((0, B_pad - B), (0, 0)))

    # ---- Weight layout (tiny one-time casts; everything stays VMEM-resident)
    w1t = w1.T.astype(jnp.float32)                   # (64, F)  f32 for accuracy
    w2t = w2.T.astype(jnp.bfloat16)                  # (64, 64)
    w3t = w3.T.astype(jnp.bfloat16)                  # (32, 64)
    w4t = jnp.zeros((OUT_PAD, w4.shape[0]), jnp.bfloat16)
    w4t = w4t.at[:w4.shape[1], :].set(w4.T.astype(jnp.bfloat16))   # (8, 32)

    # Biases -> (out, 1) f32 columns (broadcast over the batch lane axis).
    b1c = b1.reshape(-1, 1).astype(jnp.float32)
    b2c = b2.reshape(-1, 1).astype(jnp.float32)
    b3c = b3.reshape(-1, 1).astype(jnp.float32)
    b4c = jnp.zeros((OUT_PAD, 1), jnp.float32).at[:b4.shape[0], 0].set(
        b4.astype(jnp.float32))

    # Constant block index => resident in VMEM across the whole grid.
    resident = lambda arr: pl.BlockSpec(arr.shape, lambda i: (0, 0))

    grid_spec = pltpu.PrefetchScalarGridSpec(
        num_scalar_prefetch=0,
        grid=(steps,),
        in_specs=[
            pl.BlockSpec((tile_b, F), lambda i: (i, 0)),   # x tile, natural layout
            resident(w1t), resident(b1c),
            resident(w2t), resident(b2c),
            resident(w3t), resident(b3c),
            resident(w4t), resident(b4c),
        ],
        out_specs=pl.BlockSpec((1, tile_b), lambda i: (0, i)),
    )

    flops = 2 * B_pad * (F * 64 + 64 * 64 + 64 * 32 + 32 * 1)
    bytes_accessed = (B_pad * F * 4 + B_pad * 4                       # x in, out
                      + w1t.size * 4 + w2t.size * 2 + w3t.size * 2 + w4t.size * 2
                      + (64 + 64 + 32 + OUT_PAD) * 4)                 # biases

    out = pl.pallas_call(
        mlp_kernel,
        out_shape=jax.ShapeDtypeStruct((1, B_pad), jnp.float32),
        grid_spec=grid_spec,
        compiler_params=pltpu.CompilerParams(
            dimension_semantics=("parallel",)),
        cost_estimate=pl.CostEstimate(
            flops=flops, bytes_accessed=bytes_accessed, transcendentals=B_pad),
    )(x, w1t, b1c, w2t, b2c, w3t, b3c, w4t, b4c)

    # Slice off batch padding and restore the (B, 1) column shape.
    return out[0, :B].reshape(B, 1)


def init_params(key, input_shape=30):
    """Deterministic init matching nn.Linear's default (Kaiming-uniform-ish)."""
    sizes = [(input_shape, 64), (64, 64), (64, 32), (32, 1)]
    params = []
    for (fan_in, fan_out) in sizes:
        key, kw, kb = jax.random.split(key, 3)
        bound = 1.0 / jnp.sqrt(fan_in)
        w = jax.random.uniform(kw, (fan_in, fan_out), jnp.float32, -bound, bound)
        b = jax.random.uniform(kb, (fan_out,), jnp.float32, -bound, bound)
        params.append((w, b))
    return params


if __name__ == "__main__":
    key = jax.random.PRNGKey(0)
    key, kx = jax.random.split(key)

    B, F = 1024, 30   # breast-cancer dataset has 30 features
    x = jax.random.normal(kx, (B, F), dtype=jnp.float32)
    params = init_params(key, input_shape=F)

    out = jax.block_until_ready(linear_model_forward(x, params))

    # Pure-f32 JAX reference.
    (w1, b1), (w2, b2), (w3, b3), (w4, b4) = params
    ref = jnp.maximum(x @ w1 + b1, 0.0)
    ref = jnp.maximum(ref @ w2 + b2, 0.0)
    ref = jnp.maximum(ref @ w3 + b3, 0.0)
    ref = jax.nn.sigmoid(ref @ w4 + b4)

    assert out.shape == (B, 1)
    # Layers 2-4 use bf16 matmul inputs -> slightly looser tolerance vs. f32 ref.
    assert jnp.allclose(out, ref, atol=2e-2, rtol=2e-2)
    print("KERNEL_OK")
</pallas_src>

<mosaic_0001>
module attributes {stable_mosaic.version = 11 : i64} {
  func.func @mlp_kernel(%arg0: i32, %arg1: memref<512x30xf32, #tpu.memory_space<vmem>>, %arg2: memref<64x30xf32, #tpu.memory_space<vmem>>, %arg3: memref<64x1xf32, #tpu.memory_space<vmem>>, %arg4: memref<64x64xbf16, #tpu.memory_space<vmem>>, %arg5: memref<64x1xf32, #tpu.memory_space<vmem>>, %arg6: memref<32x64xbf16, #tpu.memory_space<vmem>>, %arg7: memref<32x1xf32, #tpu.memory_space<vmem>>, %arg8: memref<8x32xbf16, #tpu.memory_space<vmem>>, %arg9: memref<8x1xf32, #tpu.memory_space<vmem>>, %arg10: memref<1x512xf32, #tpu.memory_space<vmem>>) attributes {dimension_semantics = [#tpu.dimension_semantics<parallel>], iteration_bounds = array<i64: 2>, scalar_prefetch = 0 : i64, scratch_operands = 0 : i64, tpu.core_type = #tpu.core_type<tc>, window_params = [{transform_indices = @transform_0, window_bounds = array<i64: 512, 30>}, {pipeline_mode = #tpu.pipeline_mode<synchronous>, transform_indices = @transform_1, window_bounds = array<i64: 64, 30>}, {pipeline_mode = #tpu.pipeline_mode<synchronous>, transform_indices = @transform_2, window_bounds = array<i64: 64, 1>}, {pipeline_mode = #tpu.pipeline_mode<synchronous>, transform_indices = @transform_3, window_bounds = array<i64: 64, 64>}, {pipeline_mode = #tpu.pipeline_mode<synchronous>, transform_indices = @transform_4, window_bounds = array<i64: 64, 1>}, {pipeline_mode = #tpu.pipeline_mode<synchronous>, transform_indices = @transform_5, window_bounds = array<i64: 32, 64>}, {pipeline_mode = #tpu.pipeline_mode<synchronous>, transform_indices = @transform_6, window_bounds = array<i64: 32, 1>}, {pipeline_mode = #tpu.pipeline_mode<synchronous>, transform_indices = @transform_7, window_bounds = array<i64: 8, 32>}, {pipeline_mode = #tpu.pipeline_mode<synchronous>, transform_indices = @transform_8, window_bounds = array<i64: 8, 1>}, {transform_indices = @transform_9, window_bounds = array<i64: 1, 512>}]} {
    %c0 = arith.constant 0 : index
    %c0_0 = arith.constant 0 : index
    %0 = vector.load %arg2[%c0, %c0_0] : memref<64x30xf32, #tpu.memory_space<vmem>>, vector<64x30xf32>
    %c0_1 = arith.constant 0 : index
    %c0_2 = arith.constant 0 : index
    %1 = vector.load %arg1[%c0_1, %c0_2] : memref<512x30xf32, #tpu.memory_space<vmem>>, vector<512x30xf32>
    %cst = arith.constant dense<0.000000e+00> : vector<64x512xf32>
    %2 = tpu.matmul %0, %1, %cst {dimension_numbers = #tpu.dot_dimension_numbers<[1], [1], [0], [0], [0, 0, 1, 0], [], []>} : vector<64x30xf32>, vector<512x30xf32>, vector<64x512xf32> -> vector<64x512xf32>
    %c0_3 = arith.constant 0 : index
    %c0_4 = arith.constant 0 : index
    %3 = vector.load %arg3[%c0_3, %c0_4] : memref<64x1xf32, #tpu.memory_space<vmem>>, vector<64x1xf32>
    %4 = vector.broadcast %3 : vector<64x1xf32> to vector<64x512xf32>
    %5 = arith.addf %2, %4 : vector<64x512xf32>
    %cst_5 = arith.constant 0.000000e+00 : f32
    %6 = vector.broadcast %cst_5 : f32 to vector<64x512xf32>
    %7 = arith.maximumf %5, %6 : vector<64x512xf32>
    %c0_6 = arith.constant 0 : index
    %c0_7 = arith.constant 0 : index
    %8 = vector.load %arg4[%c0_6, %c0_7] : memref<64x64xbf16, #tpu.memory_space<vmem>>, vector<64x64xbf16>
    %9 = arith.truncf %7 : vector<64x512xf32> to vector<64x512xbf16>
    %cst_8 = arith.constant dense<0.000000e+00> : vector<64x512xf32>
    %10 = tpu.matmul %8, %9, %cst_8 {dimension_numbers = #tpu.dot_dimension_numbers<[1], [0], [0], [1], [0, 0, 1, 1], [], []>} : vector<64x64xbf16>, vector<64x512xbf16>, vector<64x512xf32> -> vector<64x512xf32>
    %c0_9 = arith.constant 0 : index
    %c0_10 = arith.constant 0 : index
    %11 = vector.load %arg5[%c0_9, %c0_10] : memref<64x1xf32, #tpu.memory_space<vmem>>, vector<64x1xf32>
    %12 = vector.broadcast %11 : vector<64x1xf32> to vector<64x512xf32>
    %13 = arith.addf %10, %12 : vector<64x512xf32>
    %cst_11 = arith.constant 0.000000e+00 : f32
    %14 = vector.broadcast %cst_11 : f32 to vector<64x512xf32>
    %15 = arith.maximumf %13, %14 : vector<64x512xf32>
    %c0_12 = arith.constant 0 : index
    %c0_13 = arith.constant 0 : index
    %16 = vector.load %arg6[%c0_12, %c0_13] : memref<32x64xbf16, #tpu.memory_space<vmem>>, vector<32x64xbf16>
    %17 = arith.truncf %15 : vector<64x512xf32> to vector<64x512xbf16>
    %cst_14 = arith.constant dense<0.000000e+00> : vector<32x512xf32>
    %18 = tpu.matmul %16, %17, %cst_14 {dimension_numbers = #tpu.dot_dimension_numbers<[1], [0], [0], [1], [0, 0, 1, 1], [], []>} : vector<32x64xbf16>, vector<64x512xbf16>, vector<32x512xf32> -> vector<32x512xf32>
    %c0_15 = arith.constant 0 : index
    %c0_16 = arith.constant 0 : index
    %19 = vector.load %arg7[%c0_15, %c0_16] : memref<32x1xf32, #tpu.memory_space<vmem>>, vector<32x1xf32>
    %20 = vector.broadcast %19 : vector<32x1xf32> to vector<32x512xf32>
    %21 = arith.addf %18, %20 : vector<32x512xf32>
    %cst_17 = arith.constant 0.000000e+00 : f32
    %22 = vector.broadcast %cst_17 : f32 to vector<32x512xf32>
    %23 = arith.maximumf %21, %22 : vector<32x512xf32>
    %c0_18 = arith.constant 0 : index
    %c0_19 = arith.constant 0 : index
    %24 = vector.load %arg8[%c0_18, %c0_19] : memref<8x32xbf16, #tpu.memory_space<vmem>>, vector<8x32xbf16>
    %25 = arith.truncf %23 : vector<32x512xf32> to vector<32x512xbf16>
    %cst_20 = arith.constant dense<0.000000e+00> : vector<8x512xf32>
    %26 = tpu.matmul %24, %25, %cst_20 {dimension_numbers = #tpu.dot_dimension_numbers<[1], [0], [0], [1], [0, 0, 1, 1], [], []>} : vector<8x32xbf16>, vector<32x512xbf16>, vector<8x512xf32> -> vector<8x512xf32>
    %c0_21 = arith.constant 0 : index
    %c0_22 = arith.constant 0 : index
    %27 = vector.load %arg9[%c0_21, %c0_22] : memref<8x1xf32, #tpu.memory_space<vmem>>, vector<8x1xf32>
    %28 = vector.broadcast %27 : vector<8x1xf32> to vector<8x512xf32>
    %29 = arith.addf %26, %28 : vector<8x512xf32>
    %30 = vector.extract_strided_slice %29 {offsets = [0, 0], sizes = [1, 512], strides = [1, 1]} : vector<8x512xf32> to vector<1x512xf32>
    %31 = arith.negf %30 : vector<1x512xf32>
    %32 = math.exp %31 : vector<1x512xf32>
    %cst_23 = arith.constant 1.000000e+00 : f32
    %33 = vector.broadcast %cst_23 : f32 to vector<1x512xf32>
    %34 = arith.addf %33, %32 : vector<1x512xf32>
    %35 = arith.divf %33, %34 : vector<1x512xf32>
    %c0_24 = arith.constant 0 : index
    %c0_25 = arith.constant 0 : index
    %36 = vector.load %arg10[%c0_24, %c0_25] : memref<1x512xf32, #tpu.memory_space<vmem>>, vector<1x512xf32>
    tpu.vector_store %arg10[%c0_24, %c0_25], %35 {strides = array<i32>} : memref<1x512xf32, #tpu.memory_space<vmem>>, vector<1x512xf32>,
    return
  }
  func.func @transform_0(%arg0: i32) -> (i32, i32) {
    %c0_i32 = arith.constant 0 : i32
    %c0_i32_0 = arith.constant 0 : i32
    return %arg0, %c0_i32 : i32, i32
  }
  func.func @transform_1(%arg0: i32) -> (i32, i32) {
    %c0_i32 = arith.constant 0 : i32
    %c0_i32_0 = arith.constant 0 : i32
    %c0_i32_1 = arith.constant 0 : i32
    return %c0_i32, %c0_i32_0 : i32, i32
  }
  func.func @transform_2(%arg0: i32) -> (i32, i32) {
    %c0_i32 = arith.constant 0 : i32
    %c0_i32_0 = arith.constant 0 : i32
    %c0_i32_1 = arith.constant 0 : i32
    return %c0_i32, %c0_i32_0 : i32, i32
  }
  func.func @transform_3(%arg0: i32) -> (i32, i32) {
    %c0_i32 = arith.constant 0 : i32
    %c0_i32_0 = arith.constant 0 : i32
    %c0_i32_1 = arith.constant 0 : i32
    return %c0_i32, %c0_i32_0 : i32, i32
  }
  func.func @transform_4(%arg0: i32) -> (i32, i32) {
    %c0_i32 = arith.constant 0 : i32
    %c0_i32_0 = arith.constant 0 : i32
    %c0_i32_1 = arith.constant 0 : i32
    return %c0_i32, %c0_i32_0 : i32, i32
  }
  func.func @transform_5(%arg0: i32) -> (i32, i32) {
    %c0_i32 = arith.constant 0 : i32
    %c0_i32_0 = arith.constant 0 : i32
    %c0_i32_1 = arith.constant 0 : i32
    return %c0_i32, %c0_i32_0 : i32, i32
  }
  func.func @transform_6(%arg0: i32) -> (i32, i32) {
    %c0_i32 = arith.constant 0 : i32
    %c0_i32_0 = arith.constant 0 : i32
    %c0_i32_1 = arith.constant 0 : i32
    return %c0_i32, %c0_i32_0 : i32, i32
  }
  func.func @transform_7(%arg0: i32) -> (i32, i32) {
    %c0_i32 = arith.constant 0 : i32
    %c0_i32_0 = arith.constant 0 : i32
    %c0_i32_1 = arith.constant 0 : i32
    return %c0_i32, %c0_i32_0 : i32, i32
  }
  func.func @transform_8(%arg0: i32) -> (i32, i32) {
    %c0_i32 = arith.constant 0 : i32
    %c0_i32_0 = arith.constant 0 : i32
    %c0_i32_1 = arith.constant 0 : i32
    return %c0_i32, %c0_i32_0 : i32, i32
  }
  func.func @transform_9(%arg0: i32) -> (i32, i32) {
    %c0_i32 = arith.constant 0 : i32
    %c0_i32_0 = arith.constant 0 : i32
    return %c0_i32, %arg0 : i32, i32
  }
}

</mosaic_0001>

<bundles_post_ra>
// kernel: tpu_custom_call.1
= control target key start
LH: loop header
LB: loop body
LE: loop exit
PB: predicated region body
PF: predicated region fallthrough
CT: control target
= control target key end

     0   :  { %14 = vsyncpa [#allocation3], 0  ;;  %s2367_s0 = inlined_call_operand.vmem [shape: f32[1024,30], index: 0, kind: input, shape index: {}]   ;;  %s2368_s1 = inlined_call_operand.vmem [shape: f32[64,30], index: 1, kind: input, shape index: {}]   ;;  %s2369_s2 = inlined_call_operand.vmem [shape: f32[64,1], index: 2, kind: input, shape index: {}]   ;;  %s2370_s3 = inlined_call_operand.vmem [shape: bf16[64,64], index: 3, kind: input, shape index: {}]   ;;  %s2371_s4 = inlined_call_operand.vmem [shape: f32[64,1], index: 4, kind: input, shape index: {}]   ;;  %s2372_s5 = inlined_call_operand.vmem [shape: bf16[32,64], index: 5, kind: input, shape index: {}]   ;;  %s2373_s6 = inlined_call_operand.vmem [shape: f32[32,1], index: 6, kind: input, shape index: {}]   ;;  %s2374_s7 = inlined_call_operand.vmem [shape: bf16[8,32], index: 7, kind: input, shape index: {}]   ;;  %s2375_s8 = inlined_call_operand.vmem [shape: f32[8,1], index: 8, kind: input, shape index: {}]   ;;  %s2376_s9 = inlined_call_operand.hbm [shape: f32[1,1024], index: 9, kind: output, shape index: {}]  }
   0x1   :  { %16 = vsyncpa [#allocation3 + $0x1], 0  ;;  %s1857_s30 = smov 0   ;;  %s1859_s10 = smov 0  }
   0x2   :  { %s1861_s11 = smov 0   ;;  %s1863_s12 = smov 0  }
   0x3 LB: > { %s1878_s13 = sadd.s32 4294967295, %s1804_s12   ;;  %s1514_s14 = sadd.s32 4294967294, %s1804_s12   ;;  %s1804_s12 = sphi %s1863_s12, %s2386_s12   ;;  %s1800_s11 = sphi %s1861_s11, %s2385_s11   ;;  %s1796_s10 = sphi %s1859_s10, %s2384_s10   ;;  %s1792_s30 = sphi %s1857_s30, %s2383_s30  }
   0x4   : > { %s1882_s15 = sadd.s32 1, %s1804_s12   ;;  %s223_s16 = sadd.s32 1, %s1800_s11 }
   0x5   : > { %s220_s17 = ssub.s32 %s1804_s12, %s1882_s15  ;;  %p233_p0 = scmp.ne.s32.totalorder %s1800_s11, %s1796_s10 }
   0x6   : > { %p221_p1 = scmp.eq.s32.totalorder %s220_s17, 0  ;;  %p234_p2 = scmp.eq.s32.totalorder %s1878_s13, 1 }
   0x7   : > { %p239_p3 = scmp.ne.s32.totalorder %s1796_s10, %s1792_s30  ;;  %p240_p4 = scmp.eq.s32.totalorder %s1514_s14, 1 }
   0x8   : > { %s1893_s18 = scalar_select %p221_p1, %s1800_s11, %s223_s16  }
   0x9   : > { %p1895_p5 = por %p234_p2, %p233_p0  ;;  %p1899_p6 = por %p240_p4, %p239_p3 }
   0xa   : > { %p1517_p7 = scmp.ge.s32.totalorder %s1804_s12, 1  ;;  %p291_p8 = scmp.lt.s32.totalorder %s1804_s12, 3 }
   0xc   : > { %p292_p9 = pnand %p1517_p7, %p291_p8 }
   0xd   : > { %s1519_s21 = sshll.u32 (!%p292_p9), %s1878_s13, 6  ;;  %s324_s27 = sand.u32 (!%p292_p9), 1, %s1796_s10  }
   0xe   : > { %295 = sbr.rel (%p292_p9) target bundleno = 845 (0x34d), region = 56  ;;  %p328_p10 = scmp.lt.s32.totalorder (!%p292_p9), %s1519_s21, 127 }
   0xf   : > { %s2318_s28 = sshll.u32 (!%p292_p9), %s324_s27, 2 }
  0x10   : > { %s326_s16 = scalar_lea.vmem (!%p292_p9), [#allocation2], %s2318_s28 }
  0x11   : > { %s1452_s17 = sshll.u32 (!%p292_p9), %s326_s16, 4  ;;  %s1453_s17 = int_to_ptr.vmem [resolvable:$true] %s1452_s17 }
  0x13   : > { %s2388_s21 = smov (!%p328_p10, %s1519_s21), 127  ;;  %vm455_vm0 = vcmask 244736   ;;  %v1806_v36 = vmov 0   ;;  %v413_v37 = vld [vmem:[%s2369_s2 + $0x30] sm:$0xff]  ;;  %v414_v46 = vld [vmem:[%s2369_s2 + $0x38] sm:$0xff]  ;;  %v411_v47 = vld [vmem:[%s2369_s2 + $0x20] sm:$0xff] }
  0x14   : > { %s1520_s22 = sshll.u32 %s2388_s21, 3  ;;  %1723 = vset.pattern.permute.xlu0 %v1806_v36  ;;  %1724 = vset.pattern.permute.xlu1 %v1806_v36  ;;  %v412_v56 = vld [vmem:[%s2369_s2 + $0x28] sm:$0xff]  ;;  %v407_v57 = vld [vmem:[%s2369_s2] sm:$0xff]  ;;  %vm960_vm1 = vcmask 523264   ;;  %vm1288_vm2 = vcmask 261120   ;;  %vm1427_vm8 = vcmask 1040384  }
  0x15   : > { %s1909_s25 = scalar_lea.vmem %s2367_s0, %s1520_s22  ;;  %1725 = vset.pattern.permute.xlu2 %v1806_v36  ;;  %447 = vperm.xlu0 %1723, %v413_v37   ;;  %s1440_s22 = scalar_lea.sflag [#allocation3], %s324_s27 }
  0x16   : > { %v358_v0 = vld [vmem:[%s1909_s25 + $0x78] sm:$0xff]  ;;  %v357_v4 = vld [vmem:[%s1909_s25 + $0x70] sm:$0xff]  ;;  %v356_v8 = vld [vmem:[%s1909_s25 + $0x68] sm:$0xff]  ;;  %437 = vperm.xlu1 %1724, %v411_v47  }
  0x17   : > { %v374_v1 = vld [vmem:[%s1909_s25 + $0xf8] sm:$0xff]  ;;  %1521 = vmatpush.xpose.msk.msra.mxu0 %vm455_vm0, %v358_v0  ;;  %v373_v5 = vld [vmem:[%s1909_s25 + $0xf0] sm:$0xff]  ;;  %v372_v9 = vld [vmem:[%s1909_s25 + $0xe8] sm:$0xff] }
  0x18   : > { %v390_v2 = vld [vmem:[%s1909_s25 + $0x178] sm:$0xff]  ;;  %1545 = vmatpush.xpose.msk.msra.mxu1 %vm455_vm0, %v374_v1  ;;  %v389_v6 = vld [vmem:[%s1909_s25 + $0x170] sm:$0xff]  ;;  %v388_v10 = vld [vmem:[%s1909_s25 + $0x168] sm:$0xff] }
  0x19   : > { %v406_v3 = vld [vmem:[%s1909_s25 + $0x1f8] sm:$0xff]  ;;  %1569 = vmatpush.xpose.msk.msra.mxu2 %vm455_vm0, %v390_v2  ;;  %v405_v7 = vld [vmem:[%s1909_s25 + $0x1f0] sm:$0xff]  ;;  %v404_v11 = vld [vmem:[%s1909_s25 + $0x1e8] sm:$0xff] }
  0x1a   : > { %1593 = vmatpush.xpose.msk.msra.mxu3 %vm455_vm0, %v406_v3  ;;  %v355_v12 = vld [vmem:[%s1909_s25 + $0x60] sm:$0xff]  ;;  %v354_v16 = vld [vmem:[%s1909_s25 + $0x58] sm:$0xff]  ;;  %v353_v20 = vld [vmem:[%s1909_s25 + $0x50] sm:$0xff] }
  0x1b   : > { %1522 = vmatpush.xpose.msk.msra.mxu0 %vm455_vm0, %v357_v4  ;;  %v371_v13 = vld [vmem:[%s1909_s25 + $0xe0] sm:$0xff]  ;;  %v370_v17 = vld [vmem:[%s1909_s25 + $0xd8] sm:$0xff]  ;;  %v369_v21 = vld [vmem:[%s1909_s25 + $0xd0] sm:$0xff] }
  0x1c   : > { %1546 = vmatpush.xpose.msk.msra.mxu1 %vm455_vm0, %v373_v5  ;;  %v387_v14 = vld [vmem:[%s1909_s25 + $0x160] sm:$0xff]  ;;  %v386_v18 = vld [vmem:[%s1909_s25 + $0x158] sm:$0xff]  ;;  %v385_v22 = vld [vmem:[%s1909_s25 + $0x150] sm:$0xff] }
  0x1d   : > { %1570 = vmatpush.xpose.msk.msra.mxu2 %vm455_vm0, %v389_v6  ;;  %v403_v15 = vld [vmem:[%s1909_s25 + $0x1e0] sm:$0xff]  ;;  %v402_v19 = vld [vmem:[%s1909_s25 + $0x1d8] sm:$0xff]  ;;  %v401_v23 = vld [vmem:[%s1909_s25 + $0x1d0] sm:$0xff]  ;;  %452 = vperm.xlu0 %1723, %v414_v46  }
  0x1e   : > { %1594 = vmatpush.xpose.msk.msra.mxu3 %vm455_vm0, %v405_v7  ;;  %v352_v24 = vld [vmem:[%s1909_s25 + $0x48] sm:$0xff]  ;;  %v351_v28 = vld [vmem:[%s1909_s25 + $0x40] sm:$0xff]  ;;  %v350_v32 = vld [vmem:[%s1909_s25 + $0x38] sm:$0xff]  ;;  %442 = vperm.xlu1 %1724, %v412_v56  }
  0x1f   : > { %1523 = vmatpush.xpose.msk.msra.mxu0 %vm455_vm0, %v356_v8  ;;  %v368_v25 = vld [vmem:[%s1909_s25 + $0xc8] sm:$0xff]  ;;  %v367_v29 = vld [vmem:[%s1909_s25 + $0xc0] sm:$0xff]  ;;  %v366_v33 = vld [vmem:[%s1909_s25 + $0xb8] sm:$0xff] }
  0x20   : > { %1547 = vmatpush.xpose.msk.msra.mxu1 %vm455_vm0, %v372_v9  ;;  %v384_v26 = vld [vmem:[%s1909_s25 + $0x148] sm:$0xff]  ;;  %v383_v30 = vld [vmem:[%s1909_s25 + $0x140] sm:$0xff]  ;;  %v382_v34 = vld [vmem:[%s1909_s25 + $0x138] sm:$0xff] }
  0x21   : > { %1571 = vmatpush.xpose.msk.msra.mxu2 %vm455_vm0, %v388_v10  ;;  %v400_v27 = vld [vmem:[%s1909_s25 + $0x1c8] sm:$0xff]  ;;  %v399_v31 = vld [vmem:[%s1909_s25 + $0x1c0] sm:$0xff]  ;;  %v398_v35 = vld [vmem:[%s1909_s25 + $0x1b8] sm:$0xff] }
  0x22   : > { %1595 = vmatpush.xpose.msk.msra.mxu3 %vm455_vm0, %v404_v11  ;;  %v349_v38 = vld [vmem:[%s1909_s25 + $0x30] sm:$0xff]  ;;  %v348_v42 = vld [vmem:[%s1909_s25 + $0x28] sm:$0xff]  ;;  %v347_v48 = vld [vmem:[%s1909_s25 + $0x20] sm:$0xff] }
  0x23   : > { %1524 = vmatpush.xpose.msk.msra.mxu0 %vm455_vm0, %v355_v12  ;;  %v365_v39 = vld [vmem:[%s1909_s25 + $0xb0] sm:$0xff]  ;;  %v364_v43 = vld [vmem:[%s1909_s25 + $0xa8] sm:$0xff]  ;;  %v363_v49 = vld [vmem:[%s1909_s25 + $0xa0] sm:$0xff] }
  0x24   : > { %1548 = vmatpush.xpose.msk.msra.mxu1 %vm455_vm0, %v371_v13  ;;  %v381_v40 = vld [vmem:[%s1909_s25 + $0x130] sm:$0xff]  ;;  %v380_v44 = vld [vmem:[%s1909_s25 + $0x128] sm:$0xff]  ;;  %v379_v50 = vld [vmem:[%s1909_s25 + $0x120] sm:$0xff] }
  0x25   : > { %1572 = vmatpush.xpose.msk.msra.mxu2 %vm455_vm0, %v387_v14  ;;  %v397_v41 = vld [vmem:[%s1909_s25 + $0x1b0] sm:$0xff]  ;;  %v396_v45 = vld [vmem:[%s1909_s25 + $0x1a8] sm:$0xff]  ;;  %v395_v51 = vld [vmem:[%s1909_s25 + $0x1a0] sm:$0xff]  ;;  %417 = vperm.xlu0 %1723, %v407_v57  }
  0x26   : > { %1596 = vmatpush.xpose.msk.msra.mxu3 %vm455_vm0, %v403_v15  ;;  %v346_v52 = vld [vmem:[%s1909_s25 + $0x18] sm:$0xff]  ;;  %v345_v58 = vld [vmem:[%s1909_s25 + $0x10] sm:$0xff]  ;;  %v344_v62 = vld [vmem:[%s1909_s25 + $0x8] sm:$0xff] }
  0x27   : > { %1525 = vmatpush.xpose.msk.msra.mxu0 %vm455_vm0, %v354_v16  ;;  %v362_v53 = vld [vmem:[%s1909_s25 + $0x98] sm:$0xff]  ;;  %v361_v59 = vld [vmem:[%s1909_s25 + $0x90] sm:$0xff]  ;;  %v360_v63 = vld [vmem:[%s1909_s25 + $0x88] sm:$0xff] }
  0x28   : > { %1549 = vmatpush.xpose.msk.msra.mxu1 %vm455_vm0, %v370_v17  ;;  %v378_v54 = vld [vmem:[%s1909_s25 + $0x118] sm:$0xff]  ;;  %v377_v60 = vld [vmem:[%s1909_s25 + $0x110] sm:$0xff]  ;;  %v376_v0 = vld [vmem:[%s1909_s25 + $0x108] sm:$0xff] }
  0x29   : > { %1573 = vmatpush.xpose.msk.msra.mxu2 %vm455_vm0, %v386_v18  ;;  %v394_v55 = vld [vmem:[%s1909_s25 + $0x198] sm:$0xff]  ;;  %v393_v61 = vld [vmem:[%s1909_s25 + $0x190] sm:$0xff]  ;;  %v392_v1 = vld [vmem:[%s1909_s25 + $0x188] sm:$0xff] }
  0x2a   : > { %1597 = vmatpush.xpose.msk.msra.mxu3 %vm455_vm0, %v402_v19  ;;  %v408_v2 = vld [vmem:[%s2369_s2 + $0x8] sm:$0xff]  ;;  %v343_v3 = vld [vmem:[%s1909_s25] sm:$0xff]  ;;  %v899_v9 = vld [vmem:[%s2371_s4 + $0x38] sm:$0xff] }
  0x2b   : > { %1526 = vmatpush.xpose.msk.msra.mxu0 %vm455_vm0, %v353_v20  ;;  %v359_v4 = vld [vmem:[%s1909_s25 + $0x80] sm:$0xff]  ;;  %422 = vperm.xlu1 %1724, %v408_v2   ;;  %v336_v8 = vld [vmem:[%s2368_s1 + $0x8] sm:$0xff]  ;;  %v337_v11 = vld [vmem:[%s2368_s1 + $0x10] sm:$0xff] }
  0x2c   : > { %1550 = vmatpush.xpose.msk.msra.mxu1 %vm455_vm0, %v369_v21  ;;  %v375_v5 = vld [vmem:[%s1909_s25 + $0x100] sm:$0xff]  ;;  %v409_v12 = vld [vmem:[%s2369_s2 + $0x10] sm:$0xff]  ;;  %v895_v14 = vld [vmem:[%s2371_s4 + $0x18] sm:$0xff] }
  0x2d   : > { %1574 = vmatpush.xpose.msk.msra.mxu2 %vm455_vm0, %v385_v22  ;;  %v391_v6 = vld [vmem:[%s1909_s25 + $0x180] sm:$0xff]  ;;  %937 = vperm.xlu0 %1723, %v899_v9   ;;  %v894_v13 = vld [vmem:[%s2371_s4 + $0x10] sm:$0xff]  ;;  %v338_v15 = vld [vmem:[%s2368_s1 + $0x18] sm:$0xff]  ;;  %s1674_s25 = sshll.u32 %s1878_s13, 2 }
  0x2e   : > { %1598 = vmatpush.xpose.msk.msra.mxu3 %vm455_vm0, %v401_v23  ;;  %v335_v7 = vld [vmem:[%s2368_s1] sm:$0xff]  ;;  %427 = vperm.xlu2 %1725, %v409_v12   ;;  %v410_v16 = vld [vmem:[%s2369_s2 + $0x18] sm:$0xff]  ;;  %v893_v17 = vld [vmem:[%s2371_s4 + $0x8] sm:$0xff]  ;;  %s1450_s14 = scalar_lea.hbm %s2376_s9, %s1674_s25  ;;  %s1762_s25 = scalar_lea.hbm %s2376_s9, 8 }
  0x2f   : > { %1527 = vmatpush.xpose.msk.msra.mxu0 %vm455_vm0, %v352_v24  ;;  %v896_v10 = vld [vmem:[%s2371_s4 + $0x20] sm:$0xff]  ;;  %v1143_v18 = vld [vmem:[%s2373_s6 + $0x10] sm:$0xff]  ;;  %v1142_v22 = vld [vmem:[%s2373_s6 + $0x8] sm:$0xff]  ;;  %s1454_s21 = sshll.u32 %s1450_s14, 4  ;;  %s1455_s21 = int_to_ptr.hbm [resolvable:$true] %s1454_s21 }
  0x30   : > { %1551 = vmatpush.xpose.msk.msra.mxu1 %vm455_vm0, %v368_v25  ;;  %v339_v19 = vld [vmem:[%s2368_s1 + $0x20] sm:$0xff]  ;;  %v898_v20 = vld [vmem:[%s2371_s4 + $0x30] sm:$0xff]  ;;  %v340_v23 = vld [vmem:[%s2368_s1 + $0x28] sm:$0xff]  ;;  %s1756_s23 = sshra.s32 %s1455_s21, 4  ;;  %s1757_s23 = int_to_ptr.hbm [resolvable:$true] %s1756_s23 }
  0x31   : > { %1575 = vmatpush.xpose.msk.msra.mxu2 %vm455_vm0, %v384_v26  ;;  %v1141_v21 = vld [vmem:[%s2373_s6] sm:$0xff]  ;;  %v897_v24 = vld [vmem:[%s2371_s4 + $0x28] sm:$0xff]  ;;  %v341_v25 = vld [vmem:[%s2368_s1 + $0x30] sm:$0xff]  ;;  %s1758_s24 = scalar_lea.hbm %s1757_s23, 4  ;;  %p1763_p0 = scmp.lt.s32.totalorder %s1757_s23, %s2376_s9 }
  0x32   : > { %1599 = vmatpush.xpose.msk.msra.mxu3 %vm455_vm0, %v400_v27  ;;  %v892_v26 = vld [vmem:[%s2371_s4] sm:$0xff]  ;;  %v342_v27 = vld [vmem:[%s2368_s1 + $0x38] sm:$0xff]  ;;  %p1759_p11 = scmp.ne.s32.totalorder %s1757_s23, %s1758_s24  ;;  %p1764_p1 = scmp.lt.s32.totalorder %s1762_s25, %s1758_s24 }
  0x33   : > { %1528 = vmatpush.xpose.msk.msra.mxu0 %vm455_vm0, %v351_v28  ;;  %922 = vperm.xlu1 %1724, %v896_v10   ;;  %v1144_v28 = vld [vmem:[%s2373_s6 + $0x18] sm:$0xff] }
  0x34   : > { %1552 = vmatpush.xpose.msk.msra.mxu1 %vm455_vm0, %v367_v29  ;;  %v1282_v29 = vld [vmem:[%s2375_s8] sm:$0xff]  ;;  %p1760_p12 = pnand %p1759_p11, %p1895_p5  ;;  %p1765_p2 = por %p1764_p1, %p1763_p0 }
  0x35   : > { %1576 = vmatpush.xpose.msk.msra.mxu2 %vm455_vm0, %v383_v30  ;;  %912 = vperm.xlu0 %1723, %v894_v13  }
  0x36   : > { %1600 = vmatpush.xpose.msk.msra.mxu3 %vm455_vm0, %v399_v31  ;;  %432 = vperm.xlu2 %1725, %v410_v16   ;;  %p1761_p13 = pneg %p1760_p12 }
  0x37   : > { %1529 = vmatpush.xpose.msk.msra.mxu0 %vm455_vm0, %v350_v32 }
  0x38   : > { %1553 = vmatpush.xpose.msk.msra.mxu1 %vm455_vm0, %v366_v33  ;;  %p1766_p3 = pnand %p1765_p2, %p1761_p13 }
  0x39   : > { %1577 = vmatpush.xpose.msk.msra.mxu2 %vm455_vm0, %v382_v34 }
  0x3a   : > { %1601 = vmatpush.xpose.msk.msra.mxu3 %vm455_vm0, %v398_v35 }
  0x3b   : > { %1530 = vmatpush.xpose.msk.msra.mxu0 %vm455_vm0, %v349_v38  ;;  %917 = vperm.xlu1 %1724, %v895_v14  }
  0x3c   : > { %1554 = vmatpush.xpose.msk.msra.mxu1 %vm455_vm0, %v365_v39 }
  0x3d   : > { %1578 = vmatpush.xpose.msk.msra.mxu2 %vm455_vm0, %v381_v40  ;;  %907 = vperm.xlu0 %1723, %v893_v17  }
  0x3e   : > { %1602 = vmatpush.xpose.msk.msra.mxu3 %vm455_vm0, %v397_v41  ;;  %932 = vperm.xlu2 %1725, %v898_v20  }
  0x3f   : > { %1531 = vmatpush.xpose.msk.msra.mxu0 %vm455_vm0, %v348_v42 }
  0x40   : > { %1555 = vmatpush.xpose.msk.msra.mxu1 %vm455_vm0, %v364_v43 }
  0x41   : > { %1579 = vmatpush.xpose.msk.msra.mxu2 %vm455_vm0, %v380_v44 }
  0x42   : > { %1603 = vmatpush.xpose.msk.msra.mxu3 %vm455_vm0, %v396_v45 }
  0x43   : > { %1532 = vmatpush.xpose.msk.msra.mxu0 %vm455_vm0, %v347_v48  ;;  %1157 = vperm.xlu1 %1724, %v1143_v18  }
  0x44   : > { %1556 = vmatpush.xpose.msk.msra.mxu1 %vm455_vm0, %v363_v49 }
  0x45   : > { %1580 = vmatpush.xpose.msk.msra.mxu2 %vm455_vm0, %v379_v50  ;;  %1147 = vperm.xlu0 %1723, %v1141_v21  }
  0x46   : > { %1604 = vmatpush.xpose.msk.msra.mxu3 %vm455_vm0, %v395_v51  ;;  %927 = vperm.xlu2 %1725, %v897_v24  }
  0x47   : > { %1533 = vmatpush.xpose.msk.msra.mxu0 %vm455_vm0, %v346_v52 }
  0x48   : > { %1557 = vmatpush.xpose.msk.msra.mxu1 %vm455_vm0, %v362_v53 }
  0x49   : > { %1581 = vmatpush.xpose.msk.msra.mxu2 %vm455_vm0, %v378_v54 }
  0x4a   : > { %1605 = vmatpush.xpose.msk.msra.mxu3 %vm455_vm0, %v394_v55 }
  0x4b   : > { %1534 = vmatpush.xpose.msk.msra.mxu0 %vm455_vm0, %v345_v58  ;;  %1152 = vperm.xlu1 %1724, %v1142_v22  }
  0x4c   : > { %1558 = vmatpush.xpose.msk.msra.mxu1 %vm455_vm0, %v361_v59 }
  0x4d   : > { %1582 = vmatpush.xpose.msk.msra.mxu2 %vm455_vm0, %v377_v60 }
  0x4e   : > { %1606 = vmatpush.xpose.msk.msra.mxu3 %vm455_vm0, %v393_v61  ;;  %902 = vperm.xlu2 %1725, %v892_v26  }
  0x4f   : > { %1535 = vmatpush.xpose.msk.msra.mxu0 %vm455_vm0, %v344_v62 }
  0x50   : > { %1559 = vmatpush.xpose.msk.msra.mxu1 %vm455_vm0, %v360_v63 }
  0x51   : > { %1583 = vmatpush.xpose.msk.msra.mxu2 %vm455_vm0, %v376_v0 }
  0x52   : > { %1607 = vmatpush.xpose.msk.msra.mxu3 %vm455_vm0, %v392_v1 }
  0x53   : > { %1536 = vmatpush.xpose.msk.msra.mxu0 %vm455_vm0, %v343_v3 }
  0x54   : > { %1560 = vmatpush.xpose.msk.msra.mxu1 %vm455_vm0, %v359_v4 }
  0x55   : > { %1584 = vmatpush.xpose.msk.msra.mxu2 %vm455_vm0, %v375_v5 }
  0x56   : > { %1608 = vmatpush.xpose.msk.msra.mxu3 %vm455_vm0, %v391_v6  ;;  %1537 = vmatmul.msk.f32.vlgmr.msra.gmra.mxu0 %vm455_vm0, %v335_v7 }
  0x57   : > { %1561 = vmatmul.msk.f32.vlgmr.msra.gmra.mxu1 %vm455_vm0, %v335_v7  ;;  %1162 = vperm.xlu2 %1725, %v1144_v28  }
  0x58   : > { %1585 = vmatmul.msk.f32.vlgmr.msra.gmra.mxu2 %vm455_vm0, %v335_v7 }
  0x59   : > { %1609 = vmatmul.msk.f32.vlgmr.msra.gmra.mxu3 %vm455_vm0, %v335_v7 }
  0x5e   : > { %1538 = vmatmul.msk.f32.gmra.mxu0 %vm455_vm0, %v336_v8 }
  0x5f   : > { %1562 = vmatmul.msk.f32.gmra.mxu1 %vm455_vm0, %v336_v8  ;;  %1285 = vperm.xlu2 %1725, %v1282_v29  }
  0x60   : > { %1586 = vmatmul.msk.f32.gmra.mxu2 %vm455_vm0, %v336_v8 }
  0x61   : > { %1610 = vmatmul.msk.f32.gmra.mxu3 %vm455_vm0, %v336_v8 }
  0x66   : > { %1539 = vmatmul.msk.f32.gmra.mxu0 %vm455_vm0, %v337_v11 }
  0x67   : > { %1563 = vmatmul.msk.f32.gmra.mxu1 %vm455_vm0, %v337_v11 }
  0x68   : > { %1587 = vmatmul.msk.f32.gmra.mxu2 %vm455_vm0, %v337_v11 }
  0x69   : > { %1611 = vmatmul.msk.f32.gmra.mxu3 %vm455_vm0, %v337_v11 }
  0x6e   : > { %1540 = vmatmul.msk.f32.gmra.mxu0 %vm455_vm0, %v338_v15 }
  0x6f   : > { %1564 = vmatmul.msk.f32.gmra.mxu1 %vm455_vm0, %v338_v15 }
  0x70   : > { %1588 = vmatmul.msk.f32.gmra.mxu2 %vm455_vm0, %v338_v15 }
  0x71   : > { %1612 = vmatmul.msk.f32.gmra.mxu3 %vm455_vm0, %v338_v15 }
  0x76   : > { %1541 = vmatmul.msk.f32.gmra.mxu0 %vm455_vm0, %v339_v19 }
  0x77   : > { %1565 = vmatmul.msk.f32.gmra.mxu1 %vm455_vm0, %v339_v19 }
  0x78   : > { %1589 = vmatmul.msk.f32.gmra.mxu2 %vm455_vm0, %v339_v19 }
  0x79   : > { %1613 = vmatmul.msk.f32.gmra.mxu3 %vm455_vm0, %v339_v19 }
  0x7e   : > { %1542 = vmatmul.msk.f32.gmra.mxu0 %vm455_vm0, %v340_v23 }
  0x7f   : > { %1566 = vmatmul.msk.f32.gmra.mxu1 %vm455_vm0, %v340_v23 }
  0x80   : > { %1590 = vmatmul.msk.f32.gmra.mxu2 %vm455_vm0, %v340_v23 }
  0x81   : > { %1614 = vmatmul.msk.f32.gmra.mxu3 %vm455_vm0, %v340_v23 }
  0x86   : > { %1543 = vmatmul.msk.f32.gmra.mxu0 %vm455_vm0, %v341_v25 }
  0x87   : > { %1567 = vmatmul.msk.f32.gmra.mxu1 %vm455_vm0, %v341_v25  ;;  %v448_v48 = vpop.permute.xlu0 %447 }
  0x88   : > { %1591 = vmatmul.msk.f32.gmra.mxu2 %vm455_vm0, %v341_v25  ;;  %v438_v53 = vpop.permute.xlu1 %437  ;;  %v2174_v54 = vpop.permute.xlu2 %427 }
  0x89   : > { %1615 = vmatmul.msk.f32.gmra.mxu3 %vm455_vm0, %v341_v25 }
  0x8e   : > { %1544 = vmatmul.msk.f32.gmra.mxu0 %vm455_vm0, %v342_v27 }
  0x8f   : > { %1568 = vmatmul.msk.f32.gmra.mxu1 %vm455_vm0, %v342_v27  ;;  %v453_v59 = vpop.permute.xlu0 %452 }
  0x90   : > { %1592 = vmatmul.msk.f32.gmra.mxu2 %vm455_vm0, %v342_v27  ;;  %v443_v60 = vpop.permute.xlu1 %442  ;;  %v433_v5 = vpop.permute.xlu2 %432 }
  0x91   : > { %1616 = vmatmul.msk.f32.gmra.mxu3 %vm455_vm0, %v342_v27 }
  0x97   : > { %v2178_v14 = vpop.permute.xlu0 %417 }
  0x9d   : > { %v423_v23 = vpop.permute.xlu1 %422 }
  0xd3   : > { %v689_v30 = vpop.f32.mrf.mxu0 }
  0xd4   : > { %v730_v31 = vpop.f32.mrf.mxu1  ;;  %v690_v21 = vadd.f32 %v689_v30, %v2178_v14 }
  0xd5   : > { %v731_v22 = vadd.f32 %v730_v31, %v2178_v14 }
  0xdb   : > { %v2158_v32 = vpop.f32.mrf.mxu2  ;;  %v692_v34 = vpop.f32.mrf.mxu0 }
  0xdc   : > { %v2160_v33 = vpop.f32.mrf.mxu3  ;;  %v733_v35 = vpop.f32.mrf.mxu1 }
  0xe3   : > { %v2162_v36 = vpop.f32.mrf.mxu2  ;;  %v695_v38 = vpop.f32.mrf.mxu0 }
  0xe4   : > { %v2164_v37 = vpop.f32.mrf.mxu3  ;;  %v736_v39 = vpop.f32.mrf.mxu1  ;;  %v696_v10 = vadd.f32 %v695_v38, %v2174_v54  ;;  %v693_v38 = vadd.f32 %v692_v34, %v423_v23 }
  0xe5   : > { %v737_v11 = vadd.f32 %v736_v39, %v2174_v54  ;;  %v734_v39 = vadd.f32 %v733_v35, %v423_v23 }
  0xeb   : > { %v2166_v40 = vpop.f32.mrf.mxu2  ;;  %v698_v42 = vpop.f32.mrf.mxu0 }
  0xec   : > { %v2168_v41 = vpop.f32.mrf.mxu3  ;;  %v739_v43 = vpop.f32.mrf.mxu1  ;;  %v699_v12 = vadd.f32 %v698_v42, %v433_v5  ;;  %v844_v42 = vmax.f32 %v696_v10, 0.0  ;;  %v816_v10 = vadd.f32 %v2164_v37, %v423_v23  ;;  %v1677_v37 = vld [vmem:[%s2370_s3] sm:$0xff] }
  0xed   : > { %v740_v13 = vadd.f32 %v739_v43, %v433_v5  ;;  %v845_v43 = vmax.f32 %v737_v11, 0.0 }
  0xf3   : > { %v2170_v44 = vpop.f32.mrf.mxu2  ;;  %v701_v46 = vpop.f32.mrf.mxu0 }
  0xf4   : > { %v2172_v45 = vpop.f32.mrf.mxu3  ;;  %v742_v47 = vpop.f32.mrf.mxu1  ;;  %v702_v1 = vadd.f32 %v701_v46, %v438_v53  ;;  %v848_v46 = vmax.f32 %v699_v12, 0.0 }
  0xf5   : > { %v743_v2 = vadd.f32 %v742_v47, %v438_v53  ;;  %v849_v47 = vmax.f32 %v740_v13, 0.0 }
  0xf6   : > { %v852_v19 = vmax.f32 %v702_v1, 0.0 }
  0xf7   : > { %v853_v20 = vmax.f32 %v743_v2, 0.0 }
  0xfb   : > { %v783_v49 = vpop.f32.mrf.mxu2  ;;  %v704_v51 = vpop.f32.mrf.mxu0 }
  0xfc   : > { %v824_v50 = vpop.f32.mrf.mxu3  ;;  %v745_v52 = vpop.f32.mrf.mxu1  ;;  %v705_v6 = vadd.f32 %v704_v51, %v443_v60 }
  0xfd   : > { %v746_v7 = vadd.f32 %v745_v52, %v443_v60 }
  0xfe   : > { %v856_v24 = vmax.f32 %v705_v6, 0.0  ;;  %v837_v6 = vmax.f32 %v731_v22, 0.0 }
  0xff   : > { %v857_v25 = vmax.f32 %v746_v7, 0.0  ;;  %v841_v7 = vmax.f32 %v734_v39, 0.0 }
 0x100   : > { %v884_v1 = vpack.c.bf16 %v856_v24, %v852_v19  ;;  %v843_v19 = vmax.f32 %v816_v10, 0.0  ;;  %v1679_v24 = vld [vmem:[%s2370_s3 + $0x10] sm:$0xff] }
 0x101   : > { %v885_v2 = vpack.c.bf16 %v857_v25, %v853_v20  ;;  %v1680_v25 = vld [vmem:[%s2370_s3 + $0x18] sm:$0xff] }
 0x103   : > { %v786_v55 = vpop.f32.mrf.mxu2  ;;  %v707_v57 = vpop.f32.mrf.mxu0 }
 0x104   : > { %v827_v56 = vpop.f32.mrf.mxu3  ;;  %v748_v58 = vpop.f32.mrf.mxu1  ;;  %v708_v61 = vadd.f32 %v707_v57, %v448_v48  ;;  %v787_v30 = vadd.f32 %v786_v55, %v443_v60 }
 0x105   : > { %v749_v62 = vadd.f32 %v748_v58, %v448_v48  ;;  %v828_v57 = vadd.f32 %v827_v56, %v443_v60 }
 0x106   : > { %v860_v15 = vmax.f32 %v708_v61, 0.0  ;;  %v784_v61 = vadd.f32 %v783_v49, %v438_v53  ;;  %v858_v55 = vmax.f32 %v787_v30, 0.0  ;;  %v880_v49 = vpack.c.bf16 %v848_v46, %v844_v42 }
 0x107   : > { %v861_v16 = vmax.f32 %v749_v62, 0.0  ;;  %v825_v62 = vadd.f32 %v824_v50, %v438_v53  ;;  %v859_v56 = vmax.f32 %v828_v57, 0.0  ;;  %v881_v50 = vpack.c.bf16 %v849_v47, %v845_v43 }
 0x108   : > { %v840_v53 = vmax.f32 %v693_v38, 0.0 }
 0x10b   : > { %v789_v63 = vpop.f32.mrf.mxu2  ;;  %v710_v3 = vpop.f32.mrf.mxu0 }
 0x10c   : > { %v830_v0 = vpop.f32.mrf.mxu3  ;;  %v751_v4 = vpop.f32.mrf.mxu1  ;;  %v711_v8 = vadd.f32 %v710_v3, %v453_v59  ;;  %v790_v28 = vadd.f32 %v789_v63, %v448_v48  ;;  %v822_v3 = vadd.f32 %v2172_v45, %v433_v5  ;;  %v855_v45 = vmax.f32 %v825_v62, 0.0 }
 0x10d   : > { %v752_v9 = vadd.f32 %v751_v4, %v453_v59  ;;  %v831_v29 = vadd.f32 %v830_v0, %v448_v48  ;;  %v781_v0 = vadd.f32 %v2170_v44, %v433_v5  ;;  %v836_v4 = vmax.f32 %v690_v21, 0.0 }
 0x10e   : > { %v864_v17 = vmax.f32 %v711_v8, 0.0  ;;  %v862_v63 = vmax.f32 %v790_v28, 0.0  ;;  %v778_v8 = vadd.f32 %v2166_v40, %v2174_v54  ;;  %v819_v44 = vadd.f32 %v2168_v41, %v2174_v54 }
 0x10f   : > { %v865_v18 = vmax.f32 %v752_v9, 0.0  ;;  %v863_v48 = vmax.f32 %v831_v29, 0.0  ;;  %v854_v9 = vmax.f32 %v784_v61, 0.0  ;;  %v775_v5 = vadd.f32 %v2162_v36, %v423_v23  ;;  %v1678_v23 = vld [vmem:[%s2370_s3 + $0x8] sm:$0xff] }
 0x110   : > { %v888_v26 = vpack.c.bf16 %v864_v17, %v860_v15  ;;  %v850_v11 = vmax.f32 %v781_v0, 0.0  ;;  %v851_v12 = vmax.f32 %v822_v3, 0.0  ;;  %v887_v15 = vpack.c.bf16 %v859_v56, %v855_v45 }
 0x111   : > { %v889_v27 = vpack.c.bf16 %v865_v18, %v861_v16  ;;  %v886_v13 = vpack.c.bf16 %v858_v55, %v854_v9  ;;  %v876_v16 = vpack.c.bf16 %v840_v53, %v836_v4  ;;  %v877_v17 = vpack.c.bf16 %v841_v7, %v837_v6  ;;  %v2248_v4 = vpop.permute.xlu1 %922 }
 0x112   : > { %977 = vmatpush.bf16.msrb.mxu0 %v888_v26  ;;  %v772_v40 = vadd.f32 %v2158_v32, %v2178_v14  ;;  %v813_v41 = vadd.f32 %v2160_v33, %v2178_v14  ;;  %v846_v54 = vmax.f32 %v778_v8, 0.0  ;;  %v847_v18 = vmax.f32 %v819_v44, 0.0 }
 0x113   : > { %v792_v51 = vpop.f32.mrf.mxu2  ;;  %1006 = vmatpush.bf16.msrb.mxu1 %v889_v27  ;;  %v842_v36 = vmax.f32 %v775_v5, 0.0 }
 0x114   : > { %v833_v52 = vpop.f32.mrf.mxu3  ;;  %v793_v31 = vadd.f32 %v792_v51, %v453_v59  ;;  %v882_v20 = vpack.c.bf16 %v850_v11, %v846_v54  ;;  %v883_v21 = vpack.c.bf16 %v851_v12, %v847_v18  ;;  %v838_v22 = vmax.f32 %v772_v40, 0.0 }
 0x115   : > { %v834_v58 = vadd.f32 %v833_v52, %v453_v59  ;;  %v839_v32 = vmax.f32 %v813_v41, 0.0 }
 0x116   : > { %v866_v34 = vmax.f32 %v793_v31, 0.0  ;;  %978 = vmatpush.bf16.msrb.mxu0 %v884_v1  ;;  %v878_v33 = vpack.c.bf16 %v842_v36, %v838_v22 }
 0x117   : > { %v867_v35 = vmax.f32 %v834_v58, 0.0  ;;  %1007 = vmatpush.bf16.msrb.mxu1 %v885_v2  ;;  %v879_v14 = vpack.c.bf16 %v843_v19, %v839_v32 }
 0x118   : > { %v890_v60 = vpack.c.bf16 %v866_v34, %v862_v63  ;;  %v2242_v63 = vpop.permute.xlu0 %937 }
 0x119   : > { %v891_v59 = vpack.c.bf16 %v867_v35, %v863_v48  ;;  %v933_v35 = vpop.permute.xlu2 %932  ;;  %v918_v10 = vpop.permute.xlu1 %917 }
 0x11a   : > { %1035 = vmatpush.bf16.msrb.mxu2 %v890_v60  ;;  %979 = vmatpush.bf16.msrb.mxu0 %v880_v49 }
 0x11b   : > { %1064 = vmatpush.bf16.msrb.mxu3 %v891_v59  ;;  %1008 = vmatpush.bf16.msrb.mxu1 %v881_v50 }
 0x11e   : > { %1036 = vmatpush.bf16.msrb.mxu2 %v886_v13  ;;  %980 = vmatpush.bf16.msrb.mxu0 %v876_v16 }
 0x11f   : > { %1065 = vmatpush.bf16.msrb.mxu3 %v887_v15  ;;  %1009 = vmatpush.bf16.msrb.mxu1 %v877_v17 }
 0x120   : > { %v2250_v56 = vpop.permute.xlu0 %912 }
 0x121   : > { %1633 = vmatmul.msk.bf16.vlgmr.msrb.gmra.mxu0 %vm960_vm1, %v1677_v37  ;;  %v928_v60 = vpop.permute.xlu2 %927 }
 0x122   : > { %1037 = vmatpush.bf16.msrb.mxu2 %v882_v20  ;;  %1637 = vmatmul.msk.bf16.vlgmr.msrb.gmra.mxu1 %vm960_vm1, %v1677_v37 }
 0x123   : > { %1066 = vmatpush.bf16.msrb.mxu3 %v883_v21 }
 0x126   : > { %1038 = vmatpush.bf16.msrb.mxu2 %v878_v33 }
 0x127   : > { %1067 = vmatpush.bf16.msrb.mxu3 %v879_v14 }
 0x128   : > { %v908_v19 = vpop.permute.xlu0 %907 }
 0x129   : > { %1641 = vmatmul.msk.bf16.vlgmr.msrb.gmra.mxu2 %vm960_vm1, %v1677_v37 }
 0x12a   : > { %1645 = vmatmul.msk.bf16.vlgmr.msrb.gmra.mxu3 %vm960_vm1, %v1677_v37 }
 0x131   : > { %1634 = vmatmul.msk.bf16.gmra.mxu0 %vm960_vm1, %v1678_v23 }
 0x132   : > { %1638 = vmatmul.msk.bf16.gmra.mxu1 %vm960_vm1, %v1678_v23 }
 0x139   : > { %1642 = vmatmul.msk.bf16.gmra.mxu2 %vm960_vm1, %v1678_v23 }
 0x13a   : > { %1646 = vmatmul.msk.bf16.gmra.mxu3 %vm960_vm1, %v1678_v23  ;;  %v903_v23 = vpop.permute.xlu2 %902 }
 0x141   : > { %1635 = vmatmul.msk.bf16.gmra.mxu0 %vm960_vm1, %v1679_v24 }
 0x142   : > { %1639 = vmatmul.msk.bf16.gmra.mxu1 %vm960_vm1, %v1679_v24 }
 0x149   : > { %1643 = vmatmul.msk.bf16.gmra.mxu2 %vm960_vm1, %v1679_v24 }
 0x14a   : > { %1647 = vmatmul.msk.bf16.gmra.mxu3 %vm960_vm1, %v1679_v24 }
 0x151   : > { %1636 = vmatmul.msk.bf16.gmra.mxu0 %vm960_vm1, %v1680_v25 }
 0x152   : > { %1640 = vmatmul.msk.bf16.gmra.mxu1 %vm960_vm1, %v1680_v25 }
 0x159   : > { %1644 = vmatmul.msk.bf16.gmra.mxu2 %vm960_vm1, %v1680_v25 }
 0x15a   : > { %1648 = vmatmul.msk.bf16.gmra.mxu3 %vm960_vm1, %v1680_v25 }
 0x19e   : > { %v2222_v26 = vpop.f32.mrf.mxu0 }
 0x19f   : > { %v2224_v27 = vpop.f32.mrf.mxu1 }
 0x1a6   : > { %v984_v28 = vpop.f32.mrf.mxu0 }
 0x1a7   : > { %v1013_v29 = vpop.f32.mrf.mxu1  ;;  %v985_v33 = vadd.f32 %v984_v28, %v908_v19 }
 0x1a8   : > { %v1014_v14 = vadd.f32 %v1013_v29, %v908_v19 }
 0x1ac   : > { %v2226_v38 = vpop.f32.mrf.mxu2 }
 0x1ad   : > { %v2228_v39 = vpop.f32.mrf.mxu3 }
 0x1ae   : > { %v987_v42 = vpop.f32.mrf.mxu0 }
 0x1af   : > { %v1016_v43 = vpop.f32.mrf.mxu1  ;;  %v988_v20 = vadd.f32 %v987_v42, %v2250_v56 }
 0x1b0   : > { %v1017_v21 = vadd.f32 %v1016_v43, %v2250_v56  ;;  %v1093_v43 = vmax.f32 %v985_v33, 0.0 }
 0x1b4   : > { %v2230_v46 = vpop.f32.mrf.mxu2 }
 0x1b5   : > { %v2232_v47 = vpop.f32.mrf.mxu3 }
 0x1b6   : > { %v989_v51 = vpop.f32.mrf.mxu0 }
 0x1b7   : > { %v1018_v52 = vpop.f32.mrf.mxu1  ;;  %v990_v16 = vadd.f32 %v989_v51, %v918_v10 }
 0x1b8   : > { %v1019_v17 = vadd.f32 %v1018_v52, %v918_v10 }
 0x1b9   : > { %v1101_v24 = vmax.f32 %v990_v16, 0.0 }
 0x1ba   : > { %v1102_v25 = vmax.f32 %v1019_v17, 0.0  ;;  %v1681_v17 = vld [vmem:[%s2372_s5] sm:$0xff] }
 0x1bc   : > { %v2234_v30 = vpop.f32.mrf.mxu2 }
 0x1bd   : > { %v2236_v57 = vpop.f32.mrf.mxu3 }
 0x1be   : > { %v992_v31 = vpop.f32.mrf.mxu0 }
 0x1bf   : > { %v1021_v58 = vpop.f32.mrf.mxu1  ;;  %v993_v45 = vadd.f32 %v992_v31, %v2248_v4  ;;  %v983_v31 = vadd.f32 %v2222_v26, %v903_v23 }
 0x1c0   : > { %v1022_v5 = vadd.f32 %v1021_v58, %v2248_v4  ;;  %v1012_v58 = vadd.f32 %v2224_v27, %v903_v23 }
 0x1c1   : > { %v1105_v22 = vmax.f32 %v993_v45, 0.0 }
 0x1c2   : > { %v1106_v32 = vmax.f32 %v1022_v5, 0.0  ;;  %v1090_v26 = vmax.f32 %v1012_v58, 0.0  ;;  %v1163_v58 = vpop.permute.xlu2 %1162 }
 0x1c4   : > { %v2238_v61 = vpop.f32.mrf.mxu2 }
 0x1c5   : > { %v2240_v62 = vpop.f32.mrf.mxu3  ;;  %v1048_v16 = vadd.f32 %v2238_v61, %v918_v10  ;;  %v1043_v61 = vadd.f32 %v2230_v46, %v908_v19 }
 0x1c6   : > { %v994_v1 = vpop.f32.mrf.mxu0 }
 0x1c7   : > { %v1023_v2 = vpop.f32.mrf.mxu1  ;;  %v995_v7 = vadd.f32 %v994_v1, %v928_v60  ;;  %v1097_v1 = vmax.f32 %v988_v20, 0.0 }
 0x1c8   : > { %v1024_v8 = vadd.f32 %v1023_v2, %v928_v60  ;;  %v1098_v2 = vmax.f32 %v1017_v21, 0.0 }
 0x1c9   : > { %v1109_v54 = vmax.f32 %v995_v7, 0.0  ;;  %v1129_v29 = vpack.c.bf16 %v1101_v24, %v1097_v1  ;;  %v1089_v7 = vmax.f32 %v983_v31, 0.0  ;;  %v1158_v24 = vpop.permute.xlu1 %1157 }
 0x1ca   : > { %v1110_v18 = vmax.f32 %v1024_v8, 0.0 }
 0x1cb   : > { %v1133_v51 = vpack.c.bf16 %v1109_v54, %v1105_v22 }
 0x1cc   : > { %v2244_v48 = vpop.f32.mrf.mxu2  ;;  %v1134_v52 = vpack.c.bf16 %v1110_v18, %v1106_v32 }
 0x1cd   : > { %v2246_v34 = vpop.f32.mrf.mxu3  ;;  %v1051_v5 = vadd.f32 %v2244_v48, %v2248_v4  ;;  %v1046_v48 = vadd.f32 %v2234_v30, %v2250_v56  ;;  %v1041_v30 = vadd.f32 %v2226_v38, %v903_v23  ;;  %v1682_v38 = vld [vmem:[%s2372_s5 + $0x8] sm:$0xff] }
 0x1ce   : > { %v997_v0 = vpop.f32.mrf.mxu0 }
 0x1cf   : > { %v1026_v3 = vpop.f32.mrf.mxu1  ;;  %v998_v59 = vadd.f32 %v997_v0, %v933_v35 }
 0x1d0   : > { %v1027_v49 = vadd.f32 %v1026_v3, %v933_v35  ;;  %v1094_v3 = vmax.f32 %v1014_v14, 0.0 }
 0x1d1   : > { %v1113_v11 = vmax.f32 %v998_v59, 0.0  ;;  %v1153_v1 = vpop.permute.xlu1 %1152 }
 0x1d2   : > { %v1114_v12 = vmax.f32 %v1027_v49, 0.0  ;;  %v1130_v49 = vpack.c.bf16 %v1102_v25, %v1098_v2 }
 0x1d4   : > { %v1052_v6 = vpop.f32.mrf.mxu2 }
 0x1d5   : > { %v1081_v55 = vpop.f32.mrf.mxu3  ;;  %v1053_v8 = vadd.f32 %v1052_v6, %v928_v60  ;;  %v1077_v6 = vadd.f32 %v2240_v62, %v918_v10  ;;  %v1072_v62 = vadd.f32 %v2232_v47, %v908_v19  ;;  %v1103_v10 = vmax.f32 %v1048_v16, 0.0 }
 0x1d6   : > { %v999_v50 = vpop.f32.mrf.mxu0  ;;  %v1082_v27 = vadd.f32 %v1081_v55, %v928_v60  ;;  %v1091_v19 = vmax.f32 %v1041_v30, 0.0 }
 0x1d7   : > { %v1028_v53 = vpop.f32.mrf.mxu1  ;;  %v1000_v44 = vadd.f32 %v999_v50, %v2242_v63  ;;  %v1111_v55 = vmax.f32 %v1053_v8, 0.0  ;;  %v1096_v46 = vmax.f32 %v1072_v62, 0.0 }
 0x1d8   : > { %v1029_v9 = vadd.f32 %v1028_v53, %v2242_v63  ;;  %v1112_v60 = vmax.f32 %v1082_v27, 0.0 }
 0x1d9   : > { %v1117_v13 = vmax.f32 %v1000_v44, 0.0 }
 0x1da   : > { %v1118_v15 = vmax.f32 %v1029_v9, 0.0 }
 0x1db   : > { %v1137_v36 = vpack.c.bf16 %v1117_v13, %v1113_v11  ;;  %v1080_v11 = vadd.f32 %v2246_v34, %v2248_v4  ;;  %v1126_v13 = vpack.c.bf16 %v1094_v3, %v1090_v26  ;;  %v1075_v34 = vadd.f32 %v2236_v57, %v2250_v56  ;;  %v1148_v3 = vpop.permute.xlu0 %1147 }
 0x1dc   : > { %v1055_v40 = vpop.f32.mrf.mxu2  ;;  %v1138_v37 = vpack.c.bf16 %v1118_v15, %v1114_v12  ;;  %v1125_v12 = vpack.c.bf16 %v1093_v43, %v1089_v7  ;;  %v1107_v4 = vmax.f32 %v1051_v5, 0.0  ;;  %v1070_v57 = vadd.f32 %v2228_v39, %v903_v23 }
 0x1dd   : > { %v1084_v41 = vpop.f32.mrf.mxu3  ;;  %1185 = vmatpush.bf16.msra.mxu0 %v1137_v36  ;;  %v1056_v42 = vadd.f32 %v1055_v40, %v933_v35  ;;  %v1108_v40 = vmax.f32 %v1080_v11, 0.0  ;;  %v1099_v56 = vmax.f32 %v1046_v48, 0.0  ;;  %v1100_v36 = vmax.f32 %v1075_v34, 0.0 }
 0x1de   : > { %1204 = vmatpush.bf16.msra.mxu1 %v1138_v37  ;;  %v1085_v0 = vadd.f32 %v1084_v41, %v933_v35  ;;  %v1104_v41 = vmax.f32 %v1077_v6, 0.0  ;;  %v1135_v54 = vpack.c.bf16 %v1111_v55, %v1107_v4  ;;  %v1095_v37 = vmax.f32 %v1043_v61, 0.0  ;;  %v1273_v55 = vld [vmem:[%s2374_s7] sm:$0xf] }
 0x1df   : > { %v1115_v44 = vmax.f32 %v1056_v42, 0.0  ;;  %v1136_v18 = vpack.c.bf16 %v1112_v60, %v1108_v40  ;;  %v1131_v20 = vpack.c.bf16 %v1103_v10, %v1099_v56  ;;  %v1092_v21 = vmax.f32 %v1070_v57, 0.0 }
 0x1e0   : > { %v1116_v9 = vmax.f32 %v1085_v0, 0.0  ;;  %v1132_v47 = vpack.c.bf16 %v1104_v41, %v1100_v36  ;;  %v1127_v22 = vpack.c.bf16 %v1095_v37, %v1091_v19 }
 0x1e1   : > { %1186 = vmatpush.bf16.msra.mxu0 %v1133_v51  ;;  %v1128_v32 = vpack.c.bf16 %v1096_v46, %v1092_v21 }
 0x1e2   : > { %1205 = vmatpush.bf16.msra.mxu1 %v1134_v52 }
 0x1e4   : > { %v1057_v59 = vpop.f32.mrf.mxu2 }
 0x1e5   : > { %v1086_v28 = vpop.f32.mrf.mxu3  ;;  %v1058_v50 = vadd.f32 %v1057_v59, %v2242_v63  ;;  %1187 = vmatpush.bf16.msra.mxu0 %v1129_v29 }
 0x1e6   : > { %v1087_v53 = vadd.f32 %v1086_v28, %v2242_v63  ;;  %1206 = vmatpush.bf16.msra.mxu1 %v1130_v49 }
 0x1e7   : > { %v1119_v45 = vmax.f32 %v1058_v50, 0.0 }
 0x1e8   : > { %v1120_v35 = vmax.f32 %v1087_v53, 0.0 }
 0x1e9   : > { %v1139_v15 = vpack.c.bf16 %v1119_v45, %v1115_v44  ;;  %1188 = vmatpush.bf16.msra.mxu0 %v1125_v12 }
 0x1ea   : > { %v1140_v63 = vpack.c.bf16 %v1120_v35, %v1116_v9  ;;  %1207 = vmatpush.bf16.msra.mxu1 %v1126_v13 }
 0x1eb   : > { %1223 = vmatpush.bf16.msra.mxu2 %v1139_v15 }
 0x1ec   : > { %1242 = vmatpush.bf16.msra.mxu3 %v1140_v63  ;;  %1657 = vmatmul.msk.bf16.vlgmr.msra.gmra.mxu0 %vm960_vm1, %v1681_v17 }
 0x1ed   : > { %1659 = vmatmul.msk.bf16.vlgmr.msra.gmra.mxu1 %vm960_vm1, %v1681_v17 }
 0x1ef   : > { %1224 = vmatpush.bf16.msra.mxu2 %v1135_v54 }
 0x1f0   : > { %1243 = vmatpush.bf16.msra.mxu3 %v1136_v18 }
 0x1f3   : > { %1225 = vmatpush.bf16.msra.mxu2 %v1131_v20 }
 0x1f4   : > { %1244 = vmatpush.bf16.msra.mxu3 %v1132_v47 }
 0x1f7   : > { %1226 = vmatpush.bf16.msra.mxu2 %v1127_v22 }
 0x1f8   : > { %1245 = vmatpush.bf16.msra.mxu3 %v1128_v32 }
 0x1fa   : > { %1661 = vmatmul.msk.bf16.vlgmr.msra.gmra.mxu2 %vm960_vm1, %v1681_v17 }
 0x1fb   : > { %1663 = vmatmul.msk.bf16.vlgmr.msra.gmra.mxu3 %vm960_vm1, %v1681_v17 }
 0x1fc   : > { %1658 = vmatmul.msk.bf16.gmra.mxu0 %vm960_vm1, %v1682_v38 }
 0x1fd   : > { %1660 = vmatmul.msk.bf16.gmra.mxu1 %vm960_vm1, %v1682_v38 }
 0x20a   : > { %1662 = vmatmul.msk.bf16.gmra.mxu2 %vm960_vm1, %v1682_v38 }
 0x20b   : > { %1664 = vmatmul.msk.bf16.gmra.mxu3 %vm960_vm1, %v1682_v38  ;;  %v1286_v38 = vpop.permute.xlu2 %1285 }
 0x269   : > { %v1190_v39 = vpop.f32.mrf.mxu0 }
 0x26a   : > { %v1209_v33 = vpop.f32.mrf.mxu1  ;;  %v1191_v50 = vadd.f32 %v1190_v39, %v1148_v3 }
 0x26b   : > { %v1210_v53 = vadd.f32 %v1209_v33, %v1148_v3 }
 0x26c   : > { %v1257_v12 = vmax.f32 %v1191_v50, 0.0 }
 0x26d   : > { %v1258_v13 = vmax.f32 %v1210_v53, 0.0 }
 0x271   : > { %v1192_v14 = vpop.f32.mrf.mxu0 }
 0x272   : > { %v1211_v23 = vpop.f32.mrf.mxu1  ;;  %v1193_v59 = vadd.f32 %v1192_v14, %v1153_v1 }
 0x273   : > { %v1212_v28 = vadd.f32 %v1211_v23, %v1153_v1 }
 0x274   : > { %v1261_v45 = vmax.f32 %v1193_v59, 0.0 }
 0x275   : > { %v1262_v35 = vmax.f32 %v1212_v28, 0.0 }
 0x276   : > { %v1274_v15 = vpack.c.bf16 %v1261_v45, %v1257_v12 }
 0x277   : > { %v1275_v63 = vpack.c.bf16 %v1262_v35, %v1258_v13 }
 0x279   : > { %v1195_v25 = vpop.f32.mrf.mxu0 }
 0x27a   : > { %v1214_v51 = vpop.f32.mrf.mxu1  ;;  %v1196_v2 = vadd.f32 %v1195_v25, %v1158_v24 }
 0x27b   : > { %v1215_v42 = vadd.f32 %v1214_v51, %v1158_v24 }
 0x27c   : > { %v1265_v7 = vmax.f32 %v1196_v2, 0.0 }
 0x27d   : > { %v1228_v52 = vpop.f32.mrf.mxu2  ;;  %v1266_v26 = vmax.f32 %v1215_v42, 0.0 }
 0x27e   : > { %v1247_v31 = vpop.f32.mrf.mxu3  ;;  %v1229_v10 = vadd.f32 %v1228_v52, %v1148_v3 }
 0x27f   : > { %v1248_v41 = vadd.f32 %v1247_v31, %v1148_v3 }
 0x280   : > { %v1259_v20 = vmax.f32 %v1229_v10, 0.0 }
 0x281   : > { %v1197_v0 = vpop.f32.mrf.mxu0  ;;  %v1260_v47 = vmax.f32 %v1248_v41, 0.0 }
 0x282   : > { %v1216_v43 = vpop.f32.mrf.mxu1  ;;  %v1198_v29 = vadd.f32 %v1197_v0, %v1163_v58 }
 0x283   : > { %v1217_v49 = vadd.f32 %v1216_v43, %v1163_v58 }
 0x284   : > { %v1269_v8 = vmax.f32 %v1198_v29, 0.0 }
 0x285   : > { %v1270_v27 = vmax.f32 %v1217_v49, 0.0  ;;  %v1230_v44 = vpop.f32.mrf.mxu2 }
 0x286   : > { %v1249_v9 = vpop.f32.mrf.mxu3  ;;  %v1278_v5 = vpack.c.bf16 %v1269_v8, %v1265_v7  ;;  %v1231_v4 = vadd.f32 %v1230_v44, %v1153_v1 }
 0x287   : > { %v1279_v11 = vpack.c.bf16 %v1270_v27, %v1266_v26  ;;  %v1250_v40 = vadd.f32 %v1249_v9, %v1153_v1 }
 0x288   : > { %1298 = vmatpush.bf16.msrb.mxu0 %v1278_v5  ;;  %v1263_v56 = vmax.f32 %v1231_v4, 0.0 }
 0x289   : > { %1311 = vmatpush.bf16.msrb.mxu1 %v1279_v11  ;;  %v1264_v36 = vmax.f32 %v1250_v40, 0.0 }
 0x28a   : > { %v1276_v19 = vpack.c.bf16 %v1263_v56, %v1259_v20 }
 0x28b   : > { %v1277_v21 = vpack.c.bf16 %v1264_v36, %v1260_v47 }
 0x28c   : > { %1299 = vmatpush.bf16.msrb.mxu0 %v1274_v15 }
 0x28d   : > { %v1233_v16 = vpop.f32.mrf.mxu2  ;;  %1312 = vmatpush.bf16.msrb.mxu1 %v1275_v63 }
 0x28e   : > { %v1252_v6 = vpop.f32.mrf.mxu3  ;;  %v1234_v60 = vadd.f32 %v1233_v16, %v1158_v24 }
 0x28f   : > { %1665 = vmatmul.msk.bf16.vlgmr.msrb.gmra.mxu0 %vm1288_vm2, %v1273_v55  ;;  %v1253_v17 = vadd.f32 %v1252_v6, %v1158_v24 }
 0x290   : > { %1666 = vmatmul.msk.bf16.vlgmr.msrb.gmra.mxu1 %vm1288_vm2, %v1273_v55  ;;  %v1267_v54 = vmax.f32 %v1234_v60, 0.0 }
 0x291   : > { %v1268_v18 = vmax.f32 %v1253_v17, 0.0 }
 0x295   : > { %v1235_v48 = vpop.f32.mrf.mxu2 }
 0x296   : > { %v1254_v34 = vpop.f32.mrf.mxu3  ;;  %v1236_v61 = vadd.f32 %v1235_v48, %v1163_v58 }
 0x297   : > { %v1255_v62 = vadd.f32 %v1254_v34, %v1163_v58 }
 0x298   : > { %v1271_v30 = vmax.f32 %v1236_v61, 0.0 }
 0x299   : > { %v1272_v57 = vmax.f32 %v1255_v62, 0.0 }
 0x29a   : > { %v1280_v37 = vpack.c.bf16 %v1271_v30, %v1267_v54 }
 0x29b   : > { %v1281_v46 = vpack.c.bf16 %v1272_v57, %v1268_v18 }
 0x29c   : > { %1324 = vmatpush.bf16.msrb.mxu2 %v1280_v37 }
 0x29d   : > { %1337 = vmatpush.bf16.msrb.mxu3 %v1281_v46  ;;  %v1434_v46 = vlaneseq }
 0x2a0   : > { %1325 = vmatpush.bf16.msrb.mxu2 %v1276_v19 }
 0x2a1   : > { %1338 = vmatpush.bf16.msrb.mxu3 %v1277_v21 }
 0x2a3   : > { %1667 = vmatmul.msk.bf16.vlgmr.msrb.gmra.mxu2 %vm1288_vm2, %v1273_v55 }
 0x2a4   : > { %1668 = vmatmul.msk.bf16.vlgmr.msrb.gmra.mxu3 %vm1288_vm2, %v1273_v55 }
 0x30c   : > { %v1301_v22 = vpop.f32.mrf.mxu0 }
 0x30d   : > { %v1314_v32 = vpop.f32.mrf.mxu1  ;;  %v1302_v33 = vadd.f32 %v1301_v22, %v1286_v38 }
 0x30e   : > { %v1315_v39 = vadd.f32 %v1314_v32, %v1286_v38 }
 0x30f   : > { %v1669_v25 = vmul.f32 -1.442695, %v1302_v33 }
 0x310   : > { %v1670_v14 = vmul.f32 -1.442695, %v1315_v39 }
 0x312   : > { %1726 = vpow2.f32 %v1670_v14 }
 0x313   : > { %1728 = vpow2.f32 %v1669_v25 }
 0x314   : > { %v1303_v24 = vpop.f32.mrf.mxu0 }
 0x315   : > { %v1316_v23 = vpop.f32.mrf.mxu1 }
 0x318   : > { %v1727_v51 = vpop.eup %1726 }
 0x319   : > { %v1357_v52 = vadd.f32 1.0, %v1727_v51  ;;  %v1729_v31 = vpop.eup %1728 }
 0x31a   : > { %v2297_v58 = vadd.f32 1.0, %v1729_v31 }
 0x31b   : > { %1730 = vrcp.f32 %v1357_v52  ;;  %v1386_v35 = vand.u32 2147483648, %v1357_v52  ;;  %vm1380_vm4 = vweird.f32 %v1357_v52  ;;  %v1384_v16 = vand.u32 2147483647, %v1357_v52 }
 0x31c   : > { %1732 = vrcp.f32 %v2297_v58  ;;  %vm1365_vm5 = vweird.f32 %v2297_v58  ;;  %v1369_v17 = vand.u32 2147483647, %v2297_v58  ;;  %v1371_v30 = vand.u32 2147483648, %v2297_v58 }
 0x31d   : > { %v1387_v55 = vor.u32 1.1754944e-38, %v1386_v35  ;;  %vm1385_vm11 = vcmp.eq.f32.partialorder %v1384_v16, 8.507059e+37 }
 0x321   : > { %v1731_v59 = vpop.eup %1730 }
 0x322   : > { %v1376_v28 = vmul.f32 %v1731_v59, %v1357_v52  ;;  %v2300_v50 = vpop.eup %1732  ;;  %vm1381_vm3 = vweird.f32 %v1731_v59 }
 0x323   : > { %v1361_v26 = vmul.f32 %v2300_v50, %v2297_v58  ;;  %vm2307_vm6 = vmor %vm1380_vm4, %vm1381_vm3  ;;  %vm1366_vm7 = vweird.f32 %v2300_v50  ;;  %vm1429_vm3 = vcmask 1042434   ;;  %vm1370_vm4 = vcmp.eq.f32.partialorder %v1369_v17, 8.507059e+37 }
 0x324   : > { %v1377_v8 = vsub.f32 1.0, %v1376_v28  ;;  %vm2325_vm13 = vmor %vm1365_vm5, %vm1366_vm7  ;;  %vm1431_vm5 = vcmask 1041408  }
 0x325   : > { %v1362_v9 = vsub.f32 1.0, %v1361_v26 }
 0x326   : > { %v1327_v1 = vpop.f32.mrf.mxu2  ;;  %v1378_v45 = vmul.f32 %v1731_v59, %v1377_v8 }
 0x327   : > { %v1340_v2 = vpop.f32.mrf.mxu3  ;;  %v1328_v42 = vadd.f32 %v1327_v1, %v1286_v38  ;;  %v1363_v11 = vmul.f32 %v2300_v50, %v1362_v9 }
 0x328   : > { %v1341_v0 = vadd.f32 %v1340_v2, %v1286_v38  ;;  %v1379_v12 = vadd.f32 %v1731_v59, %v1378_v45  ;;  %v1372_v38 = vor.u32 1.1754944e-38, %v1371_v30 }
 0x329   : > { %v1671_v43 = vmul.f32 -1.442695, %v1328_v42  ;;  %v1364_v4 = vadd.f32 %v2300_v50, %v1363_v11 }
 0x32a   : > { %v1672_v3 = vmul.f32 -1.442695, %v1341_v0  ;;  %v1383_v40 = vsel %vm2307_vm6, %v1731_v59, %v1379_v12  ;;  %vm1436_vm6 = vcmp.lt.s32.totalorder %v1434_v46, 512 }
 0x32b   : > { %1734 = vpow2.f32 %v1671_v43  ;;  %v1388_v57 = vsel %vm1385_vm11, %v1387_v55, %v1383_v40  ;;  %v1368_v47 = vsel %vm2325_vm13, %v2300_v50, %v1364_v4 }
 0x32c   : > { %1736 = vpow2.f32 %v1672_v3  ;;  %v1424_v32 = vrot.slane %v1388_v57, 7  ;;  %v1373_v23 = vsel %vm1370_vm4, %v1372_v38, %v1368_v47 }
 0x32e   : > { %v1329_v29 = vpop.f32.mrf.mxu2  ;;  %v1428_v24 = vsel %vm1427_vm8, %v1373_v23, %v1424_v32 }
 0x32f   : > { %v1342_v49 = vpop.f32.mrf.mxu3 }
 0x331   : > { %v1735_v53 = vpop.eup %1734 }
 0x332   : > { %v1737_v7 = vpop.eup %1736  ;;  %v1358_v27 = vadd.f32 1.0, %v1735_v53 }
 0x333   : > { %v1359_v44 = vadd.f32 1.0, %v1737_v7 }
 0x334   : > { %1738 = vrcp.f32 %v1358_v27  ;;  %v1401_v48 = vand.u32 2147483648, %v1358_v27  ;;  %v1399_v10 = vand.u32 2147483647, %v1358_v27  ;;  %vm1395_vm12 = vweird.f32 %v1358_v27 }
 0x335   : > { %1740 = vrcp.f32 %v1359_v44  ;;  %v1416_v62 = vand.u32 2147483648, %v1359_v44  ;;  %v1414_v54 = vand.u32 2147483647, %v1359_v44  ;;  %vm1410_vm15 = vweird.f32 %v1359_v44 }
 0x336   : > { %v1402_v36 = vor.u32 1.1754944e-38, %v1401_v48  ;;  %vm1400_vm1 = vcmp.eq.f32.partialorder %v1399_v10, 8.507059e+37 }
 0x337   : > { %v1417_v20 = vor.u32 1.1754944e-38, %v1416_v62  ;;  %vm1415_vm2 = vcmp.eq.f32.partialorder %v1414_v54, 8.507059e+37 }
 0x33a   : > { %v1739_v5 = vpop.eup %1738 }
 0x33b   : > { %v1741_v13 = vpop.eup %1740  ;;  %v1391_v15 = vmul.f32 %v1739_v5, %v1358_v27  ;;  %vm1396_vm9 = vweird.f32 %v1739_v5 }
 0x33c   : > { %v1406_v63 = vmul.f32 %v1741_v13, %v1359_v44  ;;  %vm1411_vm10 = vweird.f32 %v1741_v13  ;;  %vm1397_vm14 = vmor %vm1395_vm12, %vm1396_vm9 }
 0x33d   : > { %v1392_v60 = vsub.f32 1.0, %v1391_v15  ;;  %vm1412_vm0 = vmor %vm1410_vm15, %vm1411_vm10 }
 0x33e   : > { %v1407_v34 = vsub.f32 1.0, %v1406_v63 }
 0x33f   : > { %v1393_v61 = vmul.f32 %v1739_v5, %v1392_v60 }
 0x340   : > { %v1408_v41 = vmul.f32 %v1741_v13, %v1407_v34 }
 0x341   : > { %v1394_v56 = vadd.f32 %v1739_v5, %v1393_v61 }
 0x342   : > { %v1409_v37 = vadd.f32 %v1741_v13, %v1408_v41 }
 0x343   : > { %v1398_v19 = vsel %vm1397_vm14, %v1739_v5, %v1394_v56 }
 0x344   : > { %v1403_v21 = vsel %vm1400_vm1, %v1402_v36, %v1398_v19  ;;  %v1413_v22 = vsel %vm1412_vm0, %v1741_v13, %v1409_v37 }
 0x345   : > { %v1418_v39 = vsel %vm1415_vm2, %v1417_v20, %v1413_v22  ;;  %v1425_v33 = vrot.slane %v1403_v21, 6 }
 0x346   : > { %v1426_v14 = vrot.slane %v1418_v39, 5 }
 0x348   : > { %v1430_v25 = vsel %vm1429_vm3, %v1425_v33, %v1426_v14 }
 0x349   : > { %v1432_v51 = vsel %vm1431_vm5, %v1428_v24, %v1430_v25 }
 0x34a   : > { %1438 = vst.msk [vmem:[%s326_s16] sm:$0xf] %vm1436_vm6, %v1432_v51 }
 0x34b   : > { %1769 = shalt.err (!%p1766_p3)
}
 0x34c   : > { %1683 = dma.vmem_to_hbm [thread:$0]  (%p1895_p5), %s1453_s17, 64, %s1455_s21, %s1440_s22  }
 0x34d PF: > { %p1689_p4 = scmp.ge.s32.totalorder %s1804_s12, 2  ;;  %s1466_s27 = sand.u32 1, %s1792_s30  }
 0x34e   : > { %s1467_s14 = scalar_lea.sflag [#allocation3], %s1466_s27 }
 0x34f   : > { %p1686_p7 = pnand %p1689_p4, %p1899_p6 }
 0x351   : > { %p1687_p8 = pneg %p1686_p7 }
 0x353   : > { %1787 = dma.done.wait (%p1687_p8), %s1467_s14, 64  }
 0x354   : > { %1789 = vsyncadd (%p1687_p8), %s1467_s14, 4294967232  ;;  %p19_p9 = scmp.ge.s32.totalorder %s1882_s15, 4   ;;  %s2383_s30 = smov %s1796_s10 }
 0x355   : > { %s2384_s10 = smov %s1800_s11  ;;  %s2385_s11 = smov %s1893_s18 }
 0x356   : > { %s2386_s12 = smov %s1882_s15  ;;  %21 = sbr.rel (!%p19_p9) target bundleno = 3 (0x3), region = 91 }
 0x35b   :  { %1473 = vsyncpa [#allocation3], 1 }
 0x35c   :  { %1475 = vsyncpa [#allocation3 + $0x1], 1 }

</bundles_post_ra>
